<compile_context>
chip_gen: v7x
topology: tpu7x:2x2x1
jax: 0.10.0
libtpu: 0.0.40
codegen_flags: <defaults>
</compile_context>

<pallas_src>
import functools

import jax
import jax.numpy as jnp
from jax.experimental import pallas as pl
from jax.experimental.pallas import tpu as pltpu


def _msblock_kernel(x_ref, w_ref, b_ref, out_ref, *, k, p, tile_h, W):
    # x_ref  : VMEM (1, 1, C, Lh2)  halo'd H-padded slab, spatial flattened,
    #                               with p zero lanes pre/appended.
    # w_ref  : VMEM (k*k, C, C)     folded weights, w_ref[q, c, g]
    # b_ref  : VMEM (C, 1)          folded bias
    # out_ref: VMEM (1, C, tile_h*W)
    C = out_ref.shape[1]
    P = tile_h * W
    f32 = jnp.float32

    # Load the whole slab once and cast once (not per shifted window).
    xs = x_ref[0, 0].astype(f32)                                 # (C, Lh2)

    # Position-within-row along the flattened lane axis, for W-boundary masks.
    wpos = jax.lax.broadcasted_iota(jnp.int32, (C, P), 1) % W

    # k distinct column-validity masks (one per kj), hoisted out of the loop.
    masks = []
    for kj in range(k):
        dw = kj - p
        if dw > 0:
            masks.append(wpos < (W - dw))
        elif dw < 0:
            masks.append(wpos >= (-dw))
        else:
            masks.append(None)

    acc = jnp.zeros((C, P), dtype=f32)
    for ki in range(k):
        for kj in range(k):
            off = ki * W + kj                                    # static lane offset
            xq = xs[:, off:off + P]                              # (C, P) shifted window
            m = masks[kj]
            if m is not None:
                xq = jnp.where(m, xq, 0.0)                       # zero W-boundary leak
            wq = w_ref[ki * k + kj]                              # (C, C) tap weights
            acc = acc + jnp.dot(wq, xq, preferred_element_type=f32)   # MXU

    # Single coalesced, lane-dense store.
    out_ref[0, :, :] = (acc + b_ref[...]).astype(out_ref.dtype)


def _pick_tile_h(H, W, C, N):
    # tile_h must divide H; flattened tile (tile_h*W) must be a multiple of
    # 128 (lane-dense output block) unless the tile covers the whole image.
    cands = [t for t in range(1, H + 1)
             if H % t == 0 and ((t * W) % 128 == 0 or t == H)]
    # Big tiles amortize the ~0.35us/step overhead; bound the (C, P) f32
    # accumulator / slab to keep vreg+VMEM pressure sane.
    good = [t for t in cands if t * W * C * 4 <= 128 * 1024] or [min(cands)]
    tile_h = max(good)
    # v7x has 2 TensorCores sharded over the "parallel" grid axes: make sure
    # single-image inference still produces >=2 grid steps when possible.
    if N * (H // tile_h) < 2:
        two_step = [t for t in good if H // t >= 2]
        if two_step:
            tile_h = max(two_step)
    return tile_h


def msblock_kxk_1x1(x, w1, b1, w2, b2, *, kernel_size):
    """MSBlock_kxk_1x1_Layer forward.

    x  : (N, C_in, H, W)      NCHW, PyTorch layout
    w1 : (C_out, 1, k, k)     grouped kxk conv weights (groups = C_in)
    b1 : (C_out,)
    w2 : (C_in, C_out, 1, 1)  1x1 conv weights
    b2 : (C_in,)
    returns (N, C_in, H, W)
    """
    N, C, H, W = x.shape
    C_out = w1.shape[0]
    assert C_out % C == 0, "groups = C_in requires C_out % C_in == 0"
    k = int(kernel_size)
    p = k // 2                       # autopad(k)
    M = C_out // C                   # out channels per group

    # ---- fold grouped kxk conv + 1x1 conv into one dense kxk conv ----------
    #   w_eff[q, c, g] = sum_m w1[g*M+m, ki, kj] * w2[c, g*M+m]   (q = ki*k+kj)
    #   b_eff[c]       = b2[c] + sum_o w2[c, o] * b1[o]
    w1_r = w1[:, 0].astype(jnp.float32).reshape(C, M, k * k)        # (g, m, q)
    w2_2d = w2[:, :, 0, 0].astype(jnp.float32)                      # (c, o)
    w2_r = w2_2d.reshape(C, C, M)                                   # (c, g, m)
    w_eff = jnp.einsum('gmq,cgm->qcg', w1_r, w2_r)                  # (k*k, C, C)
    b_eff = (b2.astype(jnp.float32) + w2_2d @ b1.astype(jnp.float32)).reshape(C, 1)

    tile_h = _pick_tile_h(H, W, C, N)
    n_h = H // tile_h
    P = tile_h * W
    Lh2 = (tile_h + 2 * p) * W + 2 * p

    # ---- wrapper-side layout plumbing ---------------------------------------
    # Pad H only (W-boundary handled in-kernel via lane masks), then gather
    # non-overlapping halo'd H-tiles so the kernel input auto-pipelines with
    # bounded VMEM.  Flattened axis gets p zeros on each side so every tap's
    # shifted window is a non-negative static lane slice.
    x_h = jnp.pad(x, ((0, 0), (0, 0), (p, p), (0, 0)))              # (N, C, H+2p, W)
    slabs = [
        x_h[:, :, i * tile_h: i * tile_h + tile_h + 2 * p, :]
        .reshape(N, C, (tile_h + 2 * p) * W)
        for i in range(n_h)
    ]
    x_tiles = jnp.stack(slabs, axis=1)                              # (N, n_h, C, (tile_h+2p)*W)
    x_tiles = jnp.pad(x_tiles, ((0, 0), (0, 0), (0, 0), (p, p)))    # (N, n_h, C, Lh2)

    # VMEM estimate: double-buffered input + output blocks, resident weights.
    in_blk = C * Lh2 * 4
    out_blk = C * P * 4
    w_bytes = k * k * C * C * 4 + C * 4
    est_vmem = 2 * (in_blk + out_blk) + w_bytes + (1 << 20)
    cparams = dict(dimension_semantics=("parallel", "parallel"))
    if est_vmem > (16 << 20):       # only raise above smallest default (v5e)
        cparams["vmem_limit_bytes"] = int(min(est_vmem, 48 << 20))  # v7x-safe cap

    kernel = functools.partial(_msblock_kernel, k=k, p=p, tile_h=tile_h, W=W)

    out_flat = pl.pallas_call(
        kernel,
        out_shape=jax.ShapeDtypeStruct((N, C, H * W), x.dtype),
        grid_spec=pltpu.PrefetchScalarGridSpec(
            num_scalar_prefetch=0,
            grid=(N, n_h),
            in_specs=[
                # Halo'd per-tile slab: non-overlapping blocks, auto-pipelined.
                pl.BlockSpec((1, 1, C, Lh2), lambda n, i: (n, i, 0, 0)),
                # Folded weights: constant block index -> DMA'd once, VMEM-resident.
                pl.BlockSpec((k * k, C, C), lambda n, i: (0, 0, 0)),
                # Folded bias.
                pl.BlockSpec((C, 1), lambda n, i: (0, 0)),
            ],
            # Lane-dense output slab (flattened spatial on the lane axis).
            out_specs=pl.BlockSpec((1, C, P), lambda n, i: (n, 0, i)),
        ),
        compiler_params=pltpu.CompilerParams(**cparams),
    )(x_tiles, w_eff, b_eff)

    return out_flat.reshape(N, C, H, W)


def msblock_reference(x_nchw, w1, b1, w2, b2, *, kernel_size):
    """Pure-JAX reference (lax conv) for correctness checking."""
    C_in = x_nchw.shape[1]
    p = kernel_size // 2
    y = jax.lax.conv_general_dilated(
        x_nchw, w1, window_strides=(1, 1), padding=((p, p), (p, p)),
        dimension_numbers=("NCHW", "OIHW", "NCHW"),
        feature_group_count=C_in)
    y = y + b1[None, :, None, None]
    z = jax.lax.conv_general_dilated(
        y, w2, window_strides=(1, 1), padding="VALID",
        dimension_numbers=("NCHW", "OIHW", "NCHW"))
    z = z + b2[None, :, None, None]
    return z


if __name__ == "__main__":
    # small, module-consistent shapes
    N, C_in, H, W = 2, 4, 16, 16
    C_out = 8            # must be a multiple of C_in (groups = C_in)
    k = 3                # kernel_size

    key = jax.random.PRNGKey(0)
    k_x, k_w1, k_b1, k_w2, k_b2 = jax.random.split(key, 5)

    x = jax.random.normal(k_x, (N, C_in, H, W), dtype=jnp.float32)
    # in_conv: grouped kxk conv, weight (C_out, C_in/groups=1, k, k), bias (C_out,)
    w1 = jax.random.normal(k_w1, (C_out, 1, k, k), dtype=jnp.float32) * 0.1
    b1 = jax.random.normal(k_b1, (C_out,), dtype=jnp.float32) * 0.1
    # out_conv: 1x1 conv, weight (C_in, C_out, 1, 1), bias (C_in,)
    w2 = jax.random.normal(k_w2, (C_in, C_out, 1, 1), dtype=jnp.float32) * 0.1
    b2 = jax.random.normal(k_b2, (C_in,), dtype=jnp.float32) * 0.1

    out = msblock_kxk_1x1(x, w1, b1, w2, b2, kernel_size=k)
    out = jax.block_until_ready(out)

    ref = msblock_reference(x, w1, b1, w2, b2, kernel_size=k)
    assert out.shape == (N, C_in, H, W)
    assert jnp.allclose(out, ref, atol=1e-4, rtol=1e-4), (
        f"max abs err {jnp.max(jnp.abs(out - ref))}")

    print("KERNEL_OK")
</pallas_src>

<mosaic_0001>
module attributes {stable_mosaic.version = 11 : i64} {
  func.func @_msblock_kernel(%arg0: i32, %arg1: i32, %arg2: memref<1x1x4x290xf32, #tpu.memory_space<vmem>>, %arg3: memref<9x4x4xf32, #tpu.memory_space<vmem>>, %arg4: memref<4x1xf32, #tpu.memory_space<vmem>>, %arg5: memref<1x4x256xf32, #tpu.memory_space<vmem>>) attributes {dimension_semantics = [#tpu.dimension_semantics<parallel>, #tpu.dimension_semantics<parallel>], iteration_bounds = array<i64: 2, 1>, scalar_prefetch = 0 : i64, scratch_operands = 0 : i64, tpu.core_type = #tpu.core_type<tc>, window_params = [{transform_indices = @transform_0, window_bounds = array<i64: 1, 1, 4, 290>}, {pipeline_mode = #tpu.pipeline_mode<synchronous>, transform_indices = @transform_1, window_bounds = array<i64: 9, 4, 4>}, {pipeline_mode = #tpu.pipeline_mode<synchronous>, transform_indices = @transform_2, window_bounds = array<i64: 4, 1>}, {transform_indices = @transform_3, window_bounds = array<i64: 1, 4, 256>}]} {
    %c0 = arith.constant 0 : index
    %c0_0 = arith.constant 0 : index
    %c0_1 = arith.constant 0 : index
    %c0_2 = arith.constant 0 : index
    %0 = vector.load %arg2[%c0, %c0_0, %c0_1, %c0_2] : memref<1x1x4x290xf32, #tpu.memory_space<vmem>>, vector<1x1x4x290xf32>
    %1 = vector.shape_cast %0 : vector<1x1x4x290xf32> to vector<4x290xf32>
    %2 = tpu.iota {dimensions = array<i32: 1>} : vector<4x256xi32>
    %c16_i32 = arith.constant 16 : i32
    %c0_i32 = arith.constant 0 : i32
    %3 = arith.cmpi eq, %c16_i32, %c0_i32 : i32
    %c1_i32 = arith.constant 1 : i32
    %4 = arith.select %3, %c1_i32, %c16_i32 : i32
    %5 = vector.broadcast %4 : i32 to vector<4x256xi32>
    %6 = arith.remsi %2, %5 : vector<4x256xi32>
    %c0_i32_3 = arith.constant 0 : i32
    %7 = vector.broadcast %c0_i32_3 : i32 to vector<4x256xi32>
    %8 = arith.cmpi ne, %6, %7 : vector<4x256xi32>
    %c0_i32_4 = arith.constant 0 : i32
    %9 = vector.broadcast %c0_i32_4 : i32 to vector<4x256xi32>
    %10 = arith.cmpi slt, %6, %9 : vector<4x256xi32>
    %c0_i32_5 = arith.constant 0 : i32
    %11 = arith.cmpi slt, %4, %c0_i32_5 : i32
    %12 = vector.broadcast %11 : i1 to vector<4x256xi1>
    %13 = vector.broadcast %12 : vector<4x256xi1> to vector<4x256xi1>
    %14 = arith.xori %10, %13 : vector<4x256xi1>
    %15 = arith.andi %14, %8 : vector<4x256xi1>
    %16 = vector.broadcast %4 : i32 to vector<4x256xi32>
    %17 = arith.addi %6, %16 : vector<4x256xi32>
    %18 = arith.select %15, %17, %6 : vector<4x256xi1>, vector<4x256xi32>
    %c1_i32_6 = arith.constant 1 : i32
    %19 = vector.broadcast %c1_i32_6 : i32 to vector<4x256xi32>
    %20 = arith.cmpi sge, %18, %19 : vector<4x256xi32>
    %c15_i32 = arith.constant 15 : i32
    %21 = vector.broadcast %c15_i32 : i32 to vector<4x256xi32>
    %22 = arith.cmpi slt, %18, %21 : vector<4x256xi32>
    %cst = arith.constant 0.000000e+00 : f32
    %23 = vector.broadcast %cst : f32 to vector<4x256xf32>
    %24 = vector.extract_strided_slice %1 {offsets = [0, 0], sizes = [4, 256], strides = [1, 1]} : vector<4x290xf32> to vector<4x256xf32>
    %cst_7 = arith.constant 0.000000e+00 : f32
    %25 = vector.broadcast %cst_7 : f32 to vector<4x256xf32>
    %26 = arith.select %20, %24, %25 : vector<4x256xi1>, vector<4x256xf32>
    %c0_8 = arith.constant 0 : index
    %c0_9 = arith.constant 0 : index
    %c0_10 = arith.constant 0 : index
    %27 = vector.load %arg3[%c0_8, %c0_9, %c0_10] : memref<9x4x4xf32, #tpu.memory_space<vmem>>, vector<1x4x4xf32>
    %28 = vector.shape_cast %27 : vector<1x4x4xf32> to vector<4x4xf32>
    %cst_11 = arith.constant dense<0.000000e+00> : vector<4x256xf32>
    %29 = tpu.matmul %28, %26, %cst_11 {dimension_numbers = #tpu.dot_dimension_numbers<[1], [0], [0], [1], [0, 0, 1, 1], [], []>} : vector<4x4xf32>, vector<4x256xf32>, vector<4x256xf32> -> vector<4x256xf32>
    %30 = arith.addf %23, %29 : vector<4x256xf32>
    %31 = vector.extract_strided_slice %1 {offsets = [0, 1], sizes = [4, 256], strides = [1, 1]} : vector<4x290xf32> to vector<4x256xf32>
    %c1 = arith.constant 1 : index
    %c0_12 = arith.constant 0 : index
    %c0_13 = arith.constant 0 : index
    %32 = vector.load %arg3[%c1, %c0_12, %c0_13] : memref<9x4x4xf32, #tpu.memory_space<vmem>>, vector<1x4x4xf32>
    %33 = vector.shape_cast %32 : vector<1x4x4xf32> to vector<4x4xf32>
    %cst_14 = arith.constant dense<0.000000e+00> : vector<4x256xf32>
    %34 = tpu.matmul %33, %31, %cst_14 {dimension_numbers = #tpu.dot_dimension_numbers<[1], [0], [0], [1], [0, 0, 1, 1], [], []>} : vector<4x4xf32>, vector<4x256xf32>, vector<4x256xf32> -> vector<4x256xf32>
    %35 = arith.addf %30, %34 : vector<4x256xf32>
    %36 = vector.extract_strided_slice %1 {offsets = [0, 2], sizes = [4, 256], strides = [1, 1]} : vector<4x290xf32> to vector<4x256xf32>
    %cst_15 = arith.constant 0.000000e+00 : f32
    %37 = vector.broadcast %cst_15 : f32 to vector<4x256xf32>
    %38 = arith.select %22, %36, %37 : vector<4x256xi1>, vector<4x256xf32>
    %c2 = arith.constant 2 : index
    %c0_16 = arith.constant 0 : index
    %c0_17 = arith.constant 0 : index
    %39 = vector.load %arg3[%c2, %c0_16, %c0_17] : memref<9x4x4xf32, #tpu.memory_space<vmem>>, vector<1x4x4xf32>
    %40 = vector.shape_cast %39 : vector<1x4x4xf32> to vector<4x4xf32>
    %cst_18 = arith.constant dense<0.000000e+00> : vector<4x256xf32>
    %41 = tpu.matmul %40, %38, %cst_18 {dimension_numbers = #tpu.dot_dimension_numbers<[1], [0], [0], [1], [0, 0, 1, 1], [], []>} : vector<4x4xf32>, vector<4x256xf32>, vector<4x256xf32> -> vector<4x256xf32>
    %42 = arith.addf %35, %41 : vector<4x256xf32>
    %43 = vector.extract_strided_slice %1 {offsets = [0, 16], sizes = [4, 256], strides = [1, 1]} : vector<4x290xf32> to vector<4x256xf32>
    %cst_19 = arith.constant 0.000000e+00 : f32
    %44 = vector.broadcast %cst_19 : f32 to vector<4x256xf32>
    %45 = arith.select %20, %43, %44 : vector<4x256xi1>, vector<4x256xf32>
    %c3 = arith.constant 3 : index
    %c0_20 = arith.constant 0 : index
    %c0_21 = arith.constant 0 : index
    %46 = vector.load %arg3[%c3, %c0_20, %c0_21] : memref<9x4x4xf32, #tpu.memory_space<vmem>>, vector<1x4x4xf32>
    %47 = vector.shape_cast %46 : vector<1x4x4xf32> to vector<4x4xf32>
    %cst_22 = arith.constant dense<0.000000e+00> : vector<4x256xf32>
    %48 = tpu.matmul %47, %45, %cst_22 {dimension_numbers = #tpu.dot_dimension_numbers<[1], [0], [0], [1], [0, 0, 1, 1], [], []>} : vector<4x4xf32>, vector<4x256xf32>, vector<4x256xf32> -> vector<4x256xf32>
    %49 = arith.addf %42, %48 : vector<4x256xf32>
    %50 = vector.extract_strided_slice %1 {offsets = [0, 17], sizes = [4, 256], strides = [1, 1]} : vector<4x290xf32> to vector<4x256xf32>
    %c4 = arith.constant 4 : index
    %c0_23 = arith.constant 0 : index
    %c0_24 = arith.constant 0 : index
    %51 = vector.load %arg3[%c4, %c0_23, %c0_24] : memref<9x4x4xf32, #tpu.memory_space<vmem>>, vector<1x4x4xf32>
    %52 = vector.shape_cast %51 : vector<1x4x4xf32> to vector<4x4xf32>
    %cst_25 = arith.constant dense<0.000000e+00> : vector<4x256xf32>
    %53 = tpu.matmul %52, %50, %cst_25 {dimension_numbers = #tpu.dot_dimension_numbers<[1], [0], [0], [1], [0, 0, 1, 1], [], []>} : vector<4x4xf32>, vector<4x256xf32>, vector<4x256xf32> -> vector<4x256xf32>
    %54 = arith.addf %49, %53 : vector<4x256xf32>
    %55 = vector.extract_strided_slice %1 {offsets = [0, 18], sizes = [4, 256], strides = [1, 1]} : vector<4x290xf32> to vector<4x256xf32>
    %cst_26 = arith.constant 0.000000e+00 : f32
    %56 = vector.broadcast %cst_26 : f32 to vector<4x256xf32>
    %57 = arith.select %22, %55, %56 : vector<4x256xi1>, vector<4x256xf32>
    %c5 = arith.constant 5 : index
    %c0_27 = arith.constant 0 : index
    %c0_28 = arith.constant 0 : index
    %58 = vector.load %arg3[%c5, %c0_27, %c0_28] : memref<9x4x4xf32, #tpu.memory_space<vmem>>, vector<1x4x4xf32>
    %59 = vector.shape_cast %58 : vector<1x4x4xf32> to vector<4x4xf32>
    %cst_29 = arith.constant dense<0.000000e+00> : vector<4x256xf32>
    %60 = tpu.matmul %59, %57, %cst_29 {dimension_numbers = #tpu.dot_dimension_numbers<[1], [0], [0], [1], [0, 0, 1, 1], [], []>} : vector<4x4xf32>, vector<4x256xf32>, vector<4x256xf32> -> vector<4x256xf32>
    %61 = arith.addf %54, %60 : vector<4x256xf32>
    %62 = vector.extract_strided_slice %1 {offsets = [0, 32], sizes = [4, 256], strides = [1, 1]} : vector<4x290xf32> to vector<4x256xf32>
    %cst_30 = arith.constant 0.000000e+00 : f32
    %63 = vector.broadcast %cst_30 : f32 to vector<4x256xf32>
    %64 = arith.select %20, %62, %63 : vector<4x256xi1>, vector<4x256xf32>
    %c6 = arith.constant 6 : index
    %c0_31 = arith.constant 0 : index
    %c0_32 = arith.constant 0 : index
    %65 = vector.load %arg3[%c6, %c0_31, %c0_32] : memref<9x4x4xf32, #tpu.memory_space<vmem>>, vector<1x4x4xf32>
    %66 = vector.shape_cast %65 : vector<1x4x4xf32> to vector<4x4xf32>
    %cst_33 = arith.constant dense<0.000000e+00> : vector<4x256xf32>
    %67 = tpu.matmul %66, %64, %cst_33 {dimension_numbers = #tpu.dot_dimension_numbers<[1], [0], [0], [1], [0, 0, 1, 1], [], []>} : vector<4x4xf32>, vector<4x256xf32>, vector<4x256xf32> -> vector<4x256xf32>
    %68 = arith.addf %61, %67 : vector<4x256xf32>
    %69 = vector.extract_strided_slice %1 {offsets = [0, 33], sizes = [4, 256], strides = [1, 1]} : vector<4x290xf32> to vector<4x256xf32>
    %c7 = arith.constant 7 : index
    %c0_34 = arith.constant 0 : index
    %c0_35 = arith.constant 0 : index
    %70 = vector.load %arg3[%c7, %c0_34, %c0_35] : memref<9x4x4xf32, #tpu.memory_space<vmem>>, vector<1x4x4xf32>
    %71 = vector.shape_cast %70 : vector<1x4x4xf32> to vector<4x4xf32>
    %cst_36 = arith.constant dense<0.000000e+00> : vector<4x256xf32>
    %72 = tpu.matmul %71, %69, %cst_36 {dimension_numbers = #tpu.dot_dimension_numbers<[1], [0], [0], [1], [0, 0, 1, 1], [], []>} : vector<4x4xf32>, vector<4x256xf32>, vector<4x256xf32> -> vector<4x256xf32>
    %73 = arith.addf %68, %72 : vector<4x256xf32>
    %74 = vector.extract_strided_slice %1 {offsets = [0, 34], sizes = [4, 256], strides = [1, 1]} : vector<4x290xf32> to vector<4x256xf32>
    %cst_37 = arith.constant 0.000000e+00 : f32
    %75 = vector.broadcast %cst_37 : f32 to vector<4x256xf32>
    %76 = arith.select %22, %74, %75 : vector<4x256xi1>, vector<4x256xf32>
    %c8 = arith.constant 8 : index
    %c0_38 = arith.constant 0 : index
    %c0_39 = arith.constant 0 : index
    %77 = vector.load %arg3[%c8, %c0_38, %c0_39] : memref<9x4x4xf32, #tpu.memory_space<vmem>>, vector<1x4x4xf32>
    %78 = vector.shape_cast %77 : vector<1x4x4xf32> to vector<4x4xf32>
    %cst_40 = arith.constant dense<0.000000e+00> : vector<4x256xf32>
    %79 = tpu.matmul %78, %76, %cst_40 {dimension_numbers = #tpu.dot_dimension_numbers<[1], [0], [0], [1], [0, 0, 1, 1], [], []>} : vector<4x4xf32>, vector<4x256xf32>, vector<4x256xf32> -> vector<4x256xf32>
    %80 = arith.addf %73, %79 : vector<4x256xf32>
    %c0_41 = arith.constant 0 : index
    %c0_42 = arith.constant 0 : index
    %81 = vector.load %arg4[%c0_41, %c0_42] : memref<4x1xf32, #tpu.memory_space<vmem>>, vector<4x1xf32>
    %82 = vector.broadcast %81 : vector<4x1xf32> to vector<4x256xf32>
    %83 = arith.addf %80, %82 : vector<4x256xf32>
    %c0_43 = arith.constant 0 : index
    %c0_44 = arith.constant 0 : index
    %c0_45 = arith.constant 0 : index
    %84 = vector.load %arg5[%c0_43, %c0_44, %c0_45] : memref<1x4x256xf32, #tpu.memory_space<vmem>>, vector<1x4x256xf32>
    %85 = vector.shape_cast %84 : vector<1x4x256xf32> to vector<4x256xf32>
    %86 = vector.shape_cast %83 : vector<4x256xf32> to vector<1x4x256xf32>
    tpu.vector_store %arg5[%c0_43, %c0_44, %c0_45], %86 {strides = array<i32>} : memref<1x4x256xf32, #tpu.memory_space<vmem>>, vector<1x4x256xf32>,
    return
  }
  func.func @transform_0(%arg0: i32, %arg1: i32) -> (i32, i32, i32, i32) {
    %c0_i32 = arith.constant 0 : i32
    %c0_i32_0 = arith.constant 0 : i32
    %c0_i32_1 = arith.constant 0 : i32
    return %arg0, %arg1, %c0_i32, %c0_i32_0 : i32, i32, i32, i32
  }
  func.func @transform_1(%arg0: i32, %arg1: i32) -> (i32, i32, i32) {
    %c0_i32 = arith.constant 0 : i32
    %c0_i32_0 = arith.constant 0 : i32
    %c0_i32_1 = arith.constant 0 : i32
    %c0_i32_2 = arith.constant 0 : i32
    return %c0_i32, %c0_i32_0, %c0_i32_1 : i32, i32, i32
  }
  func.func @transform_2(%arg0: i32, %arg1: i32) -> (i32, i32) {
    %c0_i32 = arith.constant 0 : i32
    %c0_i32_0 = arith.constant 0 : i32
    %c0_i32_1 = arith.constant 0 : i32
    return %c0_i32, %c0_i32_0 : i32, i32
  }
  func.func @transform_3(%arg0: i32, %arg1: i32) -> (i32, i32, i32) {
    %c0_i32 = arith.constant 0 : i32
    %c0_i32_0 = arith.constant 0 : i32
    return %arg0, %c0_i32, %arg1 : i32, i32, i32
  }
}

</mosaic_0001>

<bundles_post_ra>
// kernel: tpu_custom_call.1
= control target key start
LH: loop header
LB: loop body
LE: loop exit
PB: predicated region body
PF: predicated region fallthrough
CT: control target
= control target key end

     0   :  { %8 = vsyncpa [#allocation3], 0  ;;  %s1676_s0 = inlined_call_operand.vmem [shape: f32[2,1,4,290], index: 0, kind: input, shape index: {}]   ;;  %s1677_s1 = inlined_call_operand.vmem [shape: f32[9,4,4], index: 1, kind: input, shape index: {}]   ;;  %s1678_s2 = inlined_call_operand.vmem [shape: f32[4,1], index: 2, kind: input, shape index: {}]   ;;  %s1679_s3 = inlined_call_operand.hbm [shape: f32[2,4,256], index: 3, kind: output, shape index: {}]  }
   0x1   :  { %10 = vsyncpa [#allocation3 + $0x1], 0  ;;  %s1428_s12 = smov 0   ;;  %s1430_s13 = smov 0  }
   0x2   :  { %s1432_s14 = smov 0   ;;  %s1434_s15 = smov 0  }
   0x3   :  { %s1436_s16 = smov 0   ;;  %s1438_s17 = smov 0  }
   0x4 LB: > { %s1185_s18 = sadd.s32 4294967295, %s1395_s17   ;;  %s1186_s19 = sadd.s32 4294967294, %s1395_s17   ;;  %s1395_s17 = sphi %s1438_s17, %s16_s17   ;;  %s1391_s16 = sphi %s1436_s16, %s1694_s16   ;;  %s1387_s15 = sphi %s1434_s15, %s1693_s15   ;;  %s1383_s14 = sphi %s1432_s14, %s1692_s14   ;;  %s1379_s13 = sphi %s1430_s13, %s1691_s13   ;;  %s1375_s12 = sphi %s1428_s12, %s1690_s12  }
   0x5   : > { %s28_s20 = sadd.s32 1, %s1391_s16  ;;  %s107_s21 = sadd.s32 1, %s1383_s14 }
   0x6   : > { %p30_p0 = scmp.ge.s32.totalorder %s28_s20, 2  ;;  %p117_p1 = scmp.ne.s32.totalorder %s1383_s14, %s1379_s13 }
   0x7   : > { %p118_p2 = scmp.eq.s32.totalorder %s1185_s18, 1  ;;  %p123_p3 = scmp.ne.s32.totalorder %s1379_s13, %s1375_s12 }
   0x8   : > { %s1696_s20 = smov (%p30_p0, %s28_s20), 0  ;;  %p124_p5 = scmp.eq.s32.totalorder %s1186_s19, 1 }
   0x9   : > { %p1468_p4 = por %p118_p2, %p117_p1  ;;  %s102_s23 = ssub.s32 %s1391_s16, %s1696_s20 }
   0xa   : > { %p1189_p6 = scmp.ge.s32.totalorder %s1395_s17, 1  ;;  %p105_p7 = scmp.eq.s32.totalorder %s102_s23, 0 }
   0xb   : > { %p1475_p8 = por %p124_p5, %p123_p3  ;;  %p160_p9 = scmp.lt.s32.totalorder %s1395_s17, 3 }
   0xc   : > { %s1481_s25 = scalar_select %p105_p7, %s1383_s14, %s107_s21  }
   0xd   : > { %p161_p10 = pnand %p1189_p6, %p160_p9 }
   0xe   : > { %p188_p11 = scmp.lt.s32.totalorder (!%p161_p10), %s1387_s15, 1  ;;  %s1397_s4 = smov (!%p161_p10), 111   ;;  %v1398_v3 = vmov (!%p161_p10), 0.0   ;;  %v1404_v4 = vmov (!%p161_p10), 0   ;;  %v1076_v5 = vld [vmem:[%s1678_s2] sm:$0xf] (!%p161_p10)  ;;  %v200_v6 = vlaneseq (!%p161_p10) }
   0xf   : > { %164 = sbr.rel (%p161_p10) target bundleno = 423 (0x1a7), region = 32  ;;  %685 = vmatprep.mubr.f32.mxu0 (!%p161_p10), %v1398_v3  ;;  %322 = vmatprep.mubr.f32.mxu1 (!%p161_p10), %v1398_v3  ;;  %s1399_s5 = smov (!%p161_p10), 110   ;;  %vm700_vm0 = vcmask (!%p161_p10), 900096   ;;  %vm611_vm1 = vcmask (!%p161_p10), 908288   ;;  %vm253_vm2 = vcmask (!%p161_p10), 1043456   ;;  %vm249_vm4 = vcmask (!%p161_p10), 31744  }
  0x10   : > { %s1400_s6 = smov (!%p161_p10), 127   ;;  %s1401_s7 = smov (!%p161_p10), 96   ;;  %1315 = vset.pattern.permute.xlu0 (!%p161_p10), %v1404_v4  ;;  %v201_v7 = vand.u32 (!%p161_p10), 127, %v200_v6  ;;  %v1207_v21 = vld [vmem:[%s1677_s1 + $0x10] sm:$0xf] (!%p161_p10)  ;;  %vm246_vm5 = vcmask (!%p161_p10), 1039360  }
  0x11   : > { %s1402_s8 = smov (!%p161_p10), 126   ;;  %s1403_s9 = smov (!%p161_p10), 95   ;;  %v1192_v33 = vld [vmem:[%s1677_s1 + $0x4] sm:$0xf] (!%p161_p10)  ;;  %v1211_v36 = vld [vmem:[%s1677_s1 + $0x14] sm:$0xf] (!%p161_p10) }
  0x12   : > { %s1405_s10 = smov (!%p161_p10), 112   ;;  %s1406_s11 = smov (!%p161_p10), 94   ;;  %v202_v10 = vadd.s32 (!%p161_p10), 128, %v201_v7  ;;  %v207_v14 = vand.u32 (!%p161_p10), 15, %v201_v7  ;;  %vm797_vm9 = vcmask (!%p161_p10), 785408   ;;  %vm415_vm10 = vcmask (!%p161_p10), 1031168  }
  0x13   : > { %v236_v46 = vld [vmem:[%s1677_s1] sm:$0xf] (!%p161_p10)  ;;  %v1215_v48 = vld [vmem:[%s1677_s1 + $0x18] sm:$0xf] (!%p161_p10)  ;;  %vm896_vm11 = vcmask (!%p161_p10), 777216   ;;  %vm512_vm12 = vcmask (!%p161_p10), 916480  }
  0x14   : > { %v214_v12 = vand.u32 (!%p161_p10), 15, %v202_v10  ;;  %vm1527_vm6 = vcmp.lt.s32.totalorder (!%p161_p10), %v207_v14, 15  ;;  %vm1544_vm8 = vcmp.ge.s32.totalorder (!%p161_p10), %v207_v14, 1  ;;  %v1199_v56 = vld [vmem:[%s1677_s1 + $0x8] sm:$0xf] (!%p161_p10)  ;;  %vm985_vm13 = vcmask (!%p161_p10), 769024  }
  0x15   : > { %v1219_v59 = vld [vmem:[%s1677_s1 + $0x1c] sm:$0xf] (!%p161_p10)  ;;  %s185_s23 = sand.u32 (!%p161_p10), 1, %s1379_s13  }
  0x16   : > { %s189_s26 = scalar_select %p188_p11, %s1387_s15, 1  ;;  %vm1515_vm3 = vcmp.lt.s32.totalorder %v214_v12, 15  ;;  %vm1540_vm7 = vcmp.ge.s32.totalorder %v214_v12, 1 }
  0x18   : > { %s1249_s27 = smul.u32 12, %s189_s26  ;;  %s1190_s26 = sshll.u32 %s185_s23, 3 }
  0x19   : > { %s187_s28 = scalar_lea.vmem [#allocation2], %s1190_s26 }
  0x1a   : > { %s196_s30 = scalar_lea.vmem %s1676_s0, %s1249_s27  ;;  %s1232_s27 = sshll.u32 %s1387_s15, 7 }
  0x1b   : > { %v199_v0 = vld [vmem:[%s196_s30 + $0x8] sm:$0xf]  ;;  %v1488_v1 = vld [vmem:[%s196_s30] sm:$0xff]  ;;  %s1106_s29 = sshll.u32 %s187_s28, 4  ;;  %s1407_s15 = smov [#allocation2]   ;;  %s1631_s29 = int_to_ptr.vmem [resolvable:$true] %s1106_s29 }
  0x1c   : > { %609 = vrot.lane.b32.xlu0 %v199_v0, %s1397_s4  ;;  %605 = vrot.lane.b32.xlu1 %v1488_v1, %s1397_s4  ;;  %v1493_v2 = vcombine.high %v1488_v1, %v1488_v1  ;;  %v234_v37 = vsel %vm1544_vm8, %v1488_v1, 0.0 }
  0x1e   : > { %v235_v34 = vsel %vm1540_vm7, %v1493_v2, 0.0 }
  0x20   : > { %698 = vrot.lane.b32.xlu0 %v199_v0, %s1399_s5  ;;  %696 = vrot.lane.b32.xlu1 %v1493_v2, %s1399_s5 }
  0x24   : > { %242 = vrot.lane.b32.xlu1 %v1493_v2, %s1400_s6  ;;  %607 = vrot.lane.b32.xlu0 %v1493_v2, %s1397_s4 }
  0x28   : > { %694 = vrot.lane.b32.xlu1 %v1488_v1, %s1399_s5  ;;  %244 = vrot.lane.b32.xlu0 %v199_v0, %s1400_s6  ;;  %s1629_s5 = scalar_lea.hbm %s1679_s3, %s1232_s27 }
  0x2c   : > { %793 = vrot.lane.b32.xlu1 %v1493_v2, %s1401_s7  ;;  %240 = vrot.lane.b32.xlu0 %v1488_v1, %s1400_s6  ;;  %s1090_s6 = scalar_lea.sflag [#allocation3], %s185_s23 }
  0x30   : > { %791 = vrot.lane.b32.xlu1 %v1488_v1, %s1401_s7  ;;  %795 = vrot.lane.b32.xlu0 %v199_v0, %s1401_s7  ;;  %s1317_s7 = scalar_lea.vmem %s1631_s29, 128 }
  0x31   : > { %p1318_p12 = scmp.ne.s32.totalorder %s1631_s29, %s1317_s7 }
  0x33   : > { %p1319_p13 = pnand %p1318_p12, %p1468_p4 }
  0x34   : > { %413 = vrot.lane.b32.xlu1 %v199_v0, %s1402_s8  ;;  %411 = vrot.lane.b32.xlu0 %v1493_v2, %s1402_s8 }
  0x35   : > { %p1320_p0 = pneg %p1319_p13 }
  0x38   : > { %892 = vrot.lane.b32.xlu1 %v1493_v2, %s1403_s9  ;;  %409 = vrot.lane.b32.xlu0 %v1488_v1, %s1402_s8  ;;  %s1321_s8 = sshll.u32 %s1407_s15, 4  ;;  %s1322_s8 = int_to_ptr.vmem [resolvable:$false] %s1321_s8 }
  0x39   : > { %p1324_p1 = scmp.lt.s32.totalorder %s1631_s29, %s1322_s8 }
  0x3c   : > { %890 = vrot.lane.b32.xlu1 %v1488_v1, %s1403_s9  ;;  %894 = vrot.lane.b32.xlu0 %v199_v0, %s1403_s9  ;;  %s1323_s9 = scalar_lea.vmem %s1322_s8, 256 }
  0x3d   : > { %p1325_p2 = scmp.lt.s32.totalorder %s1323_s9, %s1317_s7 }
  0x3f   : > { %p1326_p3 = por %p1325_p2, %p1324_p1 }
  0x40   : > { %510 = vrot.lane.b32.xlu1 %v199_v0, %s1405_s10  ;;  %508 = vrot.lane.b32.xlu0 %v1493_v2, %s1405_s10 }
  0x41   : > { %p1327_p5 = pnand %p1326_p3, %p1320_p0 }
  0x44   : > { %983 = vrot.lane.b32.xlu1 %v199_v0, %s1406_s11  ;;  %981 = vrot.lane.b32.xlu0 %v1493_v2, %s1406_s11 }
  0x48   : > { %979 = vrot.lane.b32.xlu1 %v1488_v1, %s1406_s11  ;;  %506 = vrot.lane.b32.xlu0 %v1488_v1, %s1405_s10 }
  0x4c   : > { %1079 = vperm.xlu0 %1315, %v1076_v5  }
  0x8e   : > { %v610_v8 = vpop.permute.xlu0 %609  ;;  %v606_v9 = vpop.permute.xlu1 %605 }
  0x92   : > { %v699_v11 = vpop.permute.xlu0 %698  ;;  %v697_v13 = vpop.permute.xlu1 %696 }
  0x93   : > { %v702_v16 = vsel %vm700_vm0, %v697_v13, %v699_v11 }
  0x94   : > { %v706_v22 = vsel %vm1515_vm3, %v702_v16, 0.0 }
  0x96   : > { %v243_v17 = vpop.permute.xlu1 %242  ;;  %v608_v18 = vpop.permute.xlu0 %607 }
  0x97   : > { %v613_v19 = vsel %vm611_vm1, %v608_v18, %v610_v8  ;;  %v612_v20 = vsel %vm611_vm1, %v606_v9, %v608_v18  ;;  %v1203_v8 = vld [vmem:[%s1677_s1 + $0xc] sm:$0xf]  ;;  %v1223_v9 = vld [vmem:[%s1677_s1 + $0x20] sm:$0xf] }
  0x98   : > { %1208 = vmatprep.subr.msk.mxu0 %vm253_vm2, %v613_v19 }
  0x99   : > { %1209 = vmatpush1.msk.msra.mxu0 %vm253_vm2, %v612_v20 }
  0x9a   : > { %v695_v24 = vpop.permute.xlu1 %694  ;;  %1212 = vmatprep.subr.msk.mxu0 %vm253_vm2, %v706_v22  ;;  %v245_v25 = vpop.permute.xlu0 %244  ;;  %1210 = vmatmul.mubr.msk.f32.vlgmr.msra.gmra.mrb[0].mxu0 %vm249_vm4, %v1207_v21 }
  0x9b   : > { %v701_v26 = vsel %vm700_vm0, %v695_v24, %v697_v13  ;;  %v248_v27 = vsel %vm246_vm5, %v243_v17, %v245_v25  ;;  %782 = vmatprep.mubr.f32.mxu0 %v1398_v3 }
  0x9c   : > { %v705_v28 = vsel %vm1527_vm6, %v701_v26, 0.0  ;;  %1193 = vmatprep.subr.msk.mxu1 %vm253_vm2, %v248_v27 }
  0x9d   : > { %1213 = vmatpush1.msk.msra.mxu0 %vm253_vm2, %v705_v28 }
  0x9e   : > { %v794_v30 = vpop.permute.xlu1 %793  ;;  %v241_v31 = vpop.permute.xlu0 %240 }
  0x9f   : > { %v247_v35 = vsel %vm246_vm5, %v241_v31, %v243_v17 }
  0xa0   : > { %1194 = vmatpush1.msk.msra.mxu1 %vm253_vm2, %v247_v35 }
  0xa1   : > { %1195 = vmatmul.mubr.msk.f32.vlgmr.msra.gmra.mrb[0].mxu1 %vm249_vm4, %v1192_v33  ;;  %1196 = vmatprep.subr.msk.mxu1 %vm253_vm2, %v235_v34 }
  0xa2   : > { %v792_v38 = vpop.permute.xlu1 %791  ;;  %v796_v39 = vpop.permute.xlu0 %795  ;;  %1214 = vmatmul.mubr.msk.f32.vlgmr.msra.gmra.mrb[0].mxu0 %vm249_vm4, %v1211_v36  ;;  %1197 = vmatpush1.msk.msra.mxu1 %vm253_vm2, %v234_v37 }
  0xa3   : > { %v798_v40 = vsel %vm797_vm9, %v792_v38, %v794_v30  ;;  %v799_v41 = vsel %vm797_vm9, %v794_v30, %v796_v39  ;;  %402 = vmatprep.mubr.f32.mxu1 %v1398_v3  ;;  %879 = vmatprep.mubr.f32.mxu0 %v1398_v3 }
  0xa4   : > { %v802_v42 = vsel %vm1544_vm8, %v798_v40, 0.0  ;;  %v803_v43 = vsel %vm1540_vm7, %v799_v41, 0.0 }
  0xa5   : > { %1216 = vmatprep.subr.msk.mxu0 %vm253_vm2, %v803_v43 }
  0xa6   : > { %v414_v44 = vpop.permute.xlu1 %413  ;;  %1217 = vmatpush1.msk.msra.mxu0 %vm253_vm2, %v802_v42  ;;  %v412_v45 = vpop.permute.xlu0 %411 }
  0xa7   : > { %v417_v47 = vsel %vm415_vm10, %v412_v45, %v414_v44 }
  0xa8   : > { %v421_v49 = vsel %vm1515_vm3, %v417_v47, 0.0 }
  0xa9   : > { %1200 = vmatprep.subr.msk.mxu1 %vm253_vm2, %v421_v49  ;;  %1198 = vmatmul.mubr.msk.f32.vlgmr.msra.gmra.mrb[0].mxu1 %vm249_vm4, %v236_v46 }
  0xaa   : > { %v893_v50 = vpop.permute.xlu1 %892  ;;  %v410_v51 = vpop.permute.xlu0 %409  ;;  %1218 = vmatmul.mubr.msk.f32.vlgmr.msra.gmra.mrb[0].mxu0 %vm249_vm4, %v1215_v48  ;;  %497 = vmatprep.mubr.f32.mxu1 %v1398_v3 }
  0xab   : > { %v416_v52 = vsel %vm415_vm10, %v410_v51, %v412_v45  ;;  %970 = vmatprep.mubr.f32.mxu0 %v1398_v3 }
  0xac   : > { %v420_v53 = vsel %vm1527_vm6, %v416_v52, 0.0 }
  0xad   : > { %1201 = vmatpush1.msk.msra.mxu1 %vm253_vm2, %v420_v53 }
  0xae   : > { %v891_v54 = vpop.permute.xlu1 %890  ;;  %v895_v55 = vpop.permute.xlu0 %894 }
  0xaf   : > { %v897_v57 = vsel %vm896_vm11, %v891_v54, %v893_v50  ;;  %v898_v58 = vsel %vm896_vm11, %v893_v50, %v895_v55 }
  0xb0   : > { %1220 = vmatprep.subr.msk.mxu0 %vm253_vm2, %v898_v58 }
  0xb1   : > { %1221 = vmatpush1.msk.msra.mxu0 %vm253_vm2, %v897_v57  ;;  %1202 = vmatmul.mubr.msk.f32.vlgmr.msra.gmra.mrb[0].mxu1 %vm249_vm4, %v1199_v56 }
  0xb2   : > { %v511_v60 = vpop.permute.xlu1 %510  ;;  %v509_v61 = vpop.permute.xlu0 %508  ;;  %1222 = vmatmul.mubr.msk.f32.vlgmr.msra.gmra.mrb[0].mxu0 %vm249_vm4, %v1219_v59  ;;  %594 = vmatprep.mubr.f32.mxu1 %v1398_v3 }
  0xb3   : > { %v514_v62 = vsel %vm512_vm12, %v509_v61, %v511_v60  ;;  %1067 = vmatprep.mubr.f32.mxu0 %v1398_v3 }
  0xb4   : > { %v518_v63 = vsel %vm1540_vm7, %v514_v62, 0.0 }
  0xb5   : > { %1204 = vmatprep.subr.msk.mxu1 %vm253_vm2, %v518_v63 }
  0xb6   : > { %v984_v0 = vpop.permute.xlu1 %983  ;;  %v982_v1 = vpop.permute.xlu0 %981 }
  0xb7   : > { %v987_v2 = vsel %vm985_vm13, %v982_v1, %v984_v0 }
  0xb8   : > { %v991_v4 = vsel %vm1515_vm3, %v987_v2, 0.0 }
  0xb9   : > { %1224 = vmatprep.subr.msk.mxu0 %vm253_vm2, %v991_v4 }
  0xba   : > { %v980_v5 = vpop.permute.xlu1 %979  ;;  %v507_v6 = vpop.permute.xlu0 %506 }
  0xbb   : > { %v986_v7 = vsel %vm985_vm13, %v980_v5, %v982_v1  ;;  %v513_v3 = vsel %vm512_vm12, %v507_v6, %v509_v61 }
  0xbc   : > { %v990_v10 = vsel %vm1527_vm6, %v986_v7, 0.0  ;;  %v517_v11 = vsel %vm1544_vm8, %v513_v3, 0.0 }
  0xbd   : > { %1205 = vmatpush1.msk.msra.mxu1 %vm253_vm2, %v517_v11  ;;  %1225 = vmatpush1.msk.msra.mxu0 %vm253_vm2, %v990_v10 }
  0xbe   : > { %1206 = vmatmul.mubr.msk.f32.vlgmr.msra.gmra.mrb[0].mxu1 %vm249_vm4, %v1203_v8  ;;  %1226 = vmatmul.mubr.msk.f32.vlgmr.msra.gmra.mrb[0].mxu0 %vm249_vm4, %v1223_v9 }
  0xcb   : > { %v1080_v12 = vpop.permute.xlu0 %1079 }
 0x191   : > { %v596_v13 = vpop.f32.mrb[0].mxu1  ;;  %v1069_v14 = vpop.f32.mrb[0].mxu0 }
 0x192   : > { %v1233_v15 = vadd.f32 %v1069_v14, %v596_v13  ;;  %v598_v16 = vpop.f32.mrb[1].mxu1  ;;  %v1071_v17 = vpop.f32.mrb[1].mxu0 }
 0x193   : > { %v1234_v18 = vadd.f32 %v1071_v17, %v598_v16 }
 0x194   : > { %v1082_v19 = vadd.f32 %v1233_v15, %v1080_v12 }
 0x195   : > { %v1083_v20 = vadd.f32 %v1234_v18, %v1080_v12 }
 0x197   : > { %v1086_v21 = vcombine.low %v1082_v19, %v1083_v20 }
 0x199   : > { %1088 = vst [vmem:[%s187_s28] sm:$0xff] %v1086_v21 }
 0x19a   : > { %1330 = shalt.err (!%p1327_p5)
}
 0x19b   : > { %s1331_s10 = scalar_lea.hbm %s1629_s5, 128  ;;  %s1335_s19 = scalar_lea.hbm %s1679_s3, 256 }
 0x19c   : > { %p1332_p6 = scmp.ne.s32.totalorder %s1629_s5, %s1331_s10  ;;  %p1336_p10 = scmp.lt.u32.totalorder %s1629_s5, %s1679_s3 }
 0x19d   : > { %p1337_p11 = scmp.lt.u32.totalorder %s1335_s19, %s1331_s10  ;;  %p1339_p13 = scmp.lt.u32.totalorder %s1331_s10, %s1629_s5 }
 0x19e   : > { %p1333_p7 = pnand %p1332_p6, %p1468_p4 }
 0x19f   : > { %p1338_p12 = por %p1337_p11, %p1336_p10 }
 0x1a0   : > { %p1334_p9 = pneg %p1333_p7 }
 0x1a1   : > { %p1340_p0 = por %p1339_p13, %p1338_p12 }
 0x1a3   : > { %p1341_p1 = pnand %p1340_p0, %p1334_p9 }
 0x1a5   : > { %1344 = shalt.err (!%p1341_p1)
}
 0x1a6   : > { %1250 = dma.vmem_to_hbm [thread:$0]  (%p1468_p4), %s1631_s29, 128, %s1629_s5, %s1090_s6  }
 0x1a7 PF: > { %p1256_p2 = scmp.ge.s32.totalorder %s1395_s17, 2  ;;  %s1118_s26 = sand.u32 1, %s1375_s12  }
 0x1a8   : > { %s1119_s27 = scalar_lea.sflag [#allocation3], %s1118_s26 }
 0x1a9   : > { %p1253_p3 = pnand %p1256_p2, %p1475_p8 }
 0x1ab   : > { %1370 = dma.done.wait (!%p1253_p3), %s1119_s27, 128  }
 0x1ac   : > { %1372 = vsyncadd (!%p1253_p3), %s1119_s27, 4294967168  ;;  %s16_s17 = sadd.s32 1, %s1395_s17   ;;  %s1690_s12 = smov %s1379_s13 }
 0x1ad   : > { %p13_p5 = scmp.ge.s32.totalorder %s16_s17, 4   ;;  %s1691_s13 = smov %s1383_s14 }
 0x1ae   : > { %s1692_s14 = smov %s1481_s25  ;;  %s1693_s15 = smov %s1391_s16 }
 0x1af   : > { %s1694_s16 = smov %s1696_s20  ;;  %15 = sbr.rel (!%p13_p5) target bundleno = 4 (0x4), region = 75 }
 0x1b6   :  { %1124 = vsyncpa [#allocation3], 1 }
 0x1b7   :  { %1126 = vsyncpa [#allocation3 + $0x1], 1 }

</bundles_post_ra>
